<compile_context>
chip_gen: v7x
topology: tpu7x:2x2x1
jax: 0.10.0
libtpu: 0.0.40
codegen_flags: <defaults>
</compile_context>

<pallas_src>
import functools
import math

import jax
import jax.numpy as jnp
from jax import lax
from jax.experimental import pallas as pl
from jax.experimental.pallas import tpu as pltpu


def _mha_fused_kernel(xq_ref, xk_ref, xv_ref, wq_ref, wk_ref, wv_ref, o_ref,
                      *, d_model, num_heads):
    """Single-step fused multi-head attention.

    xq/xk/xv : (S, D) bf16 VMEM tiles
    wq/wk/wv : (D, H*D) bf16 VMEM tiles, packed (in, head*out);
               1/sqrt(d_model) is folded into wq
    o        : (S, H*D) f32 VMEM tile  (== torch.cat(heads, dim=1))
    """
    xq = xq_ref[...]
    xk = xk_ref[...]
    xv = xv_ref[...]

    # Head-batched projections: one (S,D)@(D,H*D) MXU matmul each, f32 accum.
    q_all = jnp.dot(xq, wq_ref[...], preferred_element_type=jnp.float32)
    k_all = jnp.dot(xk, wk_ref[...], preferred_element_type=jnp.float32)
    v_all = jnp.dot(xv, wv_ref[...], preferred_element_type=jnp.float32)

    # Per-head attention: static unrolled loop over 128-aligned lane slices.
    for h in range(num_heads):
        sl = slice(h * d_model, (h + 1) * d_model)
        q_h = q_all[:, sl].astype(jnp.bfloat16)
        k_h = k_all[:, sl].astype(jnp.bfloat16)
        v_h = v_all[:, sl].astype(jnp.bfloat16)

        # sims = q @ k^T: contract the feature axis of both operands so the
        # transpose folds into the MXU weight push (no XLU vxpose).
        # The sqrt(d_model) scaling is already folded into wq.
        sims = lax.dot_general(q_h, k_h,
                               dimension_numbers=(((1,), (1,)), ((), ())),
                               preferred_element_type=jnp.float32)

        # Softmax statistics in f32.
        m = jnp.max(sims, axis=-1, keepdims=True)
        e = jnp.exp(sims - m)
        denom = jnp.sum(e, axis=-1, keepdims=True)
        # EUP approximate reciprocal + one Newton step (denom >= 1 always,
        # since the max exp term is exactly 1 -> no div-by-zero).
        r = pl.reciprocal(denom, approx=True)
        r = r * (2.0 - denom * r)

        # Flash-style finalize: normalize AFTER the PV matmul ((S,D) multiply
        # instead of an (S,S) one).
        pv = jnp.dot(e.astype(jnp.bfloat16), v_h,
                     preferred_element_type=jnp.float32)
        o_ref[:, sl] = (pv * r).astype(o_ref.dtype)


def prepare_mha_params(wq, wk, wv):
    """One-time parameter packing (done at load time, NOT per forward).

    wq/wk/wv: (H, D, D) f32 in PyTorch Linear layout (out, in) per head.
    Returns three (D, H*D) bf16 slabs laid out (in, head*out); the
    1/sqrt(d_model) softmax scale is folded into the Q weights.
    """
    H, D, _ = wq.shape
    scale = jnp.float32(1.0 / math.sqrt(D))

    def pack(w, s=None):
        w_t = jnp.swapaxes(w, 1, 2)            # (H, in, out): y = x @ W^T
        if s is not None:
            w_t = w_t * s
        w_t = jnp.transpose(w_t, (1, 0, 2))    # (in, H, out)
        return w_t.reshape(D, H * D).astype(jnp.bfloat16)

    return pack(wq, scale), pack(wk), pack(wv)


def multi_head_attention(enc_q, enc_k, enc_v, wq_p, wk_p, wv_p, *, num_heads):
    """Pallas multi-head attention forward.

    enc_q/enc_k/enc_v : (S, D) float32
    wq_p/wk_p/wv_p    : (D, H*D) bf16 packed weights from prepare_mha_params
    returns           : (S, H*D) float32 == torch.cat(heads, dim=1)
    """
    S, D = enc_q.shape
    HD = wq_p.shape[1]
    assert HD == num_heads * D

    x_spec = pl.BlockSpec((S, D), lambda i: (0, 0))
    w_spec = pl.BlockSpec((D, HD), lambda i: (0, 0))
    out_spec = pl.BlockSpec((S, HD), lambda i: (0, 0))

    flops = 2 * 3 * S * D * HD + num_heads * 2 * (2 * S * S * D)
    bytes_accessed = 2 * (3 * S * D + 3 * D * HD) + 4 * S * HD
    cost = pl.CostEstimate(flops=flops,
                           transcendentals=num_heads * S * S,
                           bytes_accessed=bytes_accessed)

    kernel = functools.partial(_mha_fused_kernel, d_model=D,
                               num_heads=num_heads)

    return pl.pallas_call(
        kernel,
        out_shape=jax.ShapeDtypeStruct((S, HD), jnp.float32),
        grid_spec=pltpu.PrefetchScalarGridSpec(
            num_scalar_prefetch=0,
            grid=(1,),
            in_specs=[x_spec, x_spec, x_spec, w_spec, w_spec, w_spec],
            out_specs=out_spec,
        ),
        compiler_params=pltpu.CompilerParams(
            dimension_semantics=("arbitrary",)),
        cost_estimate=cost,
    )(enc_q.astype(jnp.bfloat16), enc_k.astype(jnp.bfloat16),
      enc_v.astype(jnp.bfloat16), wq_p, wk_p, wv_p)


def _reference(enc_q, enc_k, enc_v, wq, wk, wv):
    """Pure-JAX reference mirroring the PyTorch module's math and the kernel's
    mixed-precision cast points (bf16 matmul operands, f32 accumulation), per
    the perf-review note on comparing against a bf16 reference."""
    H, D, _ = wq.shape
    scale = jnp.float32(1.0 / math.sqrt(D))
    xq = enc_q.astype(jnp.bfloat16)
    xk = enc_k.astype(jnp.bfloat16)
    xv = enc_v.astype(jnp.bfloat16)
    outs = []
    for h in range(H):
        q = jnp.dot(xq, (wq[h].T * scale).astype(jnp.bfloat16),
                    preferred_element_type=jnp.float32)
        k = jnp.dot(xk, wk[h].T.astype(jnp.bfloat16),
                    preferred_element_type=jnp.float32)
        v = jnp.dot(xv, wv[h].T.astype(jnp.bfloat16),
                    preferred_element_type=jnp.float32)
        sims = jnp.dot(q.astype(jnp.bfloat16), k.astype(jnp.bfloat16).T,
                       preferred_element_type=jnp.float32)
        m = jnp.max(sims, axis=-1, keepdims=True)
        e = jnp.exp(sims - m)
        denom = jnp.sum(e, axis=-1, keepdims=True)
        pv = jnp.dot(e.astype(jnp.bfloat16), v.astype(jnp.bfloat16),
                     preferred_element_type=jnp.float32)
        outs.append(pv / denom)
    return jnp.concatenate(outs, axis=1)


if __name__ == "__main__":
    # Small shapes consistent with the module's forward: (seq, d_model) inputs
    # and H independent heads each with three (d_model, d_model) Linear
    # weights. d_model is a multiple of 128 so all BlockSpecs are
    # (8,128)-aligned and every store is lane-dense.
    S = 8          # sequence length
    D = 128        # d_model
    H = 2          # num_heads

    key = jax.random.PRNGKey(0)
    k1, k2, k3, k4, k5, k6 = jax.random.split(key, 6)

    enc_q = jax.random.normal(k1, (S, D), dtype=jnp.float32)
    enc_k = jax.random.normal(k2, (S, D), dtype=jnp.float32)
    enc_v = jax.random.normal(k3, (S, D), dtype=jnp.float32)

    # PyTorch Linear layout: (out, in) per head.
    wq = jax.random.normal(k4, (H, D, D), dtype=jnp.float32) * 0.1
    wk = jax.random.normal(k5, (H, D, D), dtype=jnp.float32) * 0.1
    wv = jax.random.normal(k6, (H, D, D), dtype=jnp.float32) * 0.1

    # Parameter packing done once, outside the forward path.
    wq_p, wk_p, wv_p = prepare_mha_params(wq, wk, wv)

    fwd = jax.jit(functools.partial(multi_head_attention, num_heads=H))
    out = jax.block_until_ready(fwd(enc_q, enc_k, enc_v, wq_p, wk_p, wv_p))

    ref = _reference(enc_q, enc_k, enc_v, wq, wk, wv)
    assert out.shape == (S, H * D)
    # Tolerance reflects bf16 matmul operands (f32 accumulation); the
    # reference uses the same cast points so agreement is far tighter.
    assert jnp.allclose(out, ref, atol=2e-2, rtol=2e-2), "mismatch vs reference"

    print("KERNEL_OK")
</pallas_src>

<mosaic_0001>
module attributes {stable_mosaic.version = 11 : i64} {
  func.func @_mha_fused_kernel(%arg0: i32, %arg1: memref<8x128xbf16, #tpu.memory_space<vmem>>, %arg2: memref<8x128xbf16, #tpu.memory_space<vmem>>, %arg3: memref<8x128xbf16, #tpu.memory_space<vmem>>, %arg4: memref<128x256xbf16, #tpu.memory_space<vmem>>, %arg5: memref<128x256xbf16, #tpu.memory_space<vmem>>, %arg6: memref<128x256xbf16, #tpu.memory_space<vmem>>, %arg7: memref<8x256xf32, #tpu.memory_space<vmem>>) attributes {dimension_semantics = [#tpu.dimension_semantics<arbitrary>], iteration_bounds = array<i64: 1>, scalar_prefetch = 0 : i64, scratch_operands = 0 : i64, tpu.core_type = #tpu.core_type<tc>, window_params = [{pipeline_mode = #tpu.pipeline_mode<synchronous>, transform_indices = @transform_0, window_bounds = array<i64: 8, 128>}, {pipeline_mode = #tpu.pipeline_mode<synchronous>, transform_indices = @transform_1, window_bounds = array<i64: 8, 128>}, {pipeline_mode = #tpu.pipeline_mode<synchronous>, transform_indices = @transform_2, window_bounds = array<i64: 8, 128>}, {pipeline_mode = #tpu.pipeline_mode<synchronous>, transform_indices = @transform_3, window_bounds = array<i64: 128, 256>}, {pipeline_mode = #tpu.pipeline_mode<synchronous>, transform_indices = @transform_4, window_bounds = array<i64: 128, 256>}, {pipeline_mode = #tpu.pipeline_mode<synchronous>, transform_indices = @transform_5, window_bounds = array<i64: 128, 256>}, {pipeline_mode = #tpu.pipeline_mode<synchronous>, transform_indices = @transform_6, window_bounds = array<i64: 8, 256>}]} {
    %c0 = arith.constant 0 : index
    %c0_0 = arith.constant 0 : index
    %0 = vector.load %arg1[%c0, %c0_0] : memref<8x128xbf16, #tpu.memory_space<vmem>>, vector<8x128xbf16>
    %c0_1 = arith.constant 0 : index
    %c0_2 = arith.constant 0 : index
    %1 = vector.load %arg2[%c0_1, %c0_2] : memref<8x128xbf16, #tpu.memory_space<vmem>>, vector<8x128xbf16>
    %c0_3 = arith.constant 0 : index
    %c0_4 = arith.constant 0 : index
    %2 = vector.load %arg3[%c0_3, %c0_4] : memref<8x128xbf16, #tpu.memory_space<vmem>>, vector<8x128xbf16>
    %c0_5 = arith.constant 0 : index
    %c0_6 = arith.constant 0 : index
    %3 = vector.load %arg4[%c0_5, %c0_6] : memref<128x256xbf16, #tpu.memory_space<vmem>>, vector<128x256xbf16>
    %cst = arith.constant dense<0.000000e+00> : vector<8x256xf32>
    %4 = tpu.matmul %0, %3, %cst {dimension_numbers = #tpu.dot_dimension_numbers<[1], [0], [0], [1], [0, 0, 1, 1], [], []>} : vector<8x128xbf16>, vector<128x256xbf16>, vector<8x256xf32> -> vector<8x256xf32>
    %c0_7 = arith.constant 0 : index
    %c0_8 = arith.constant 0 : index
    %5 = vector.load %arg5[%c0_7, %c0_8] : memref<128x256xbf16, #tpu.memory_space<vmem>>, vector<128x256xbf16>
    %cst_9 = arith.constant dense<0.000000e+00> : vector<8x256xf32>
    %6 = tpu.matmul %1, %5, %cst_9 {dimension_numbers = #tpu.dot_dimension_numbers<[1], [0], [0], [1], [0, 0, 1, 1], [], []>} : vector<8x128xbf16>, vector<128x256xbf16>, vector<8x256xf32> -> vector<8x256xf32>
    %c0_10 = arith.constant 0 : index
    %c0_11 = arith.constant 0 : index
    %7 = vector.load %arg6[%c0_10, %c0_11] : memref<128x256xbf16, #tpu.memory_space<vmem>>, vector<128x256xbf16>
    %cst_12 = arith.constant dense<0.000000e+00> : vector<8x256xf32>
    %8 = tpu.matmul %2, %7, %cst_12 {dimension_numbers = #tpu.dot_dimension_numbers<[1], [0], [0], [1], [0, 0, 1, 1], [], []>} : vector<8x128xbf16>, vector<128x256xbf16>, vector<8x256xf32> -> vector<8x256xf32>
    %9 = vector.extract_strided_slice %4 {offsets = [0, 0], sizes = [8, 128], strides = [1, 1]} : vector<8x256xf32> to vector<8x128xf32>
    %10 = arith.truncf %9 : vector<8x128xf32> to vector<8x128xbf16>
    %11 = vector.extract_strided_slice %6 {offsets = [0, 0], sizes = [8, 128], strides = [1, 1]} : vector<8x256xf32> to vector<8x128xf32>
    %12 = arith.truncf %11 : vector<8x128xf32> to vector<8x128xbf16>
    %13 = vector.extract_strided_slice %8 {offsets = [0, 0], sizes = [8, 128], strides = [1, 1]} : vector<8x256xf32> to vector<8x128xf32>
    %14 = arith.truncf %13 : vector<8x128xf32> to vector<8x128xbf16>
    %cst_13 = arith.constant dense<0.000000e+00> : vector<8x8xf32>
    %15 = tpu.matmul %10, %12, %cst_13 {dimension_numbers = #tpu.dot_dimension_numbers<[1], [1], [0], [0], [0, 0, 1, 0], [], []>} : vector<8x128xbf16>, vector<8x128xbf16>, vector<8x8xf32> -> vector<8x8xf32>
    %cst_14 = arith.constant dense<0xFF800000> : vector<8xf32>
    %16 = vector.multi_reduction <maximumf>, %15, %cst_14 [1] : vector<8x8xf32> to vector<8xf32>
    %17 = vector.shape_cast %16 : vector<8xf32> to vector<8x1xf32>
    %18 = vector.broadcast %17 : vector<8x1xf32> to vector<8x8xf32>
    %19 = arith.subf %15, %18 : vector<8x8xf32>
    %20 = math.exp %19 : vector<8x8xf32>
    %cst_15 = arith.constant dense<0.000000e+00> : vector<8xf32>
    %21 = vector.multi_reduction <add>, %20, %cst_15 [1] : vector<8x8xf32> to vector<8xf32>
    %22 = vector.shape_cast %21 : vector<8xf32> to vector<8x1xf32>
    %23 = tpu.reciprocal %22 {approx = true} : vector<8x1xf32> -> vector<8x1xf32>
    %24 = arith.mulf %22, %23 : vector<8x1xf32>
    %cst_16 = arith.constant 2.000000e+00 : f32
    %25 = vector.broadcast %cst_16 : f32 to vector<8x1xf32>
    %26 = arith.subf %25, %24 : vector<8x1xf32>
    %27 = arith.mulf %23, %26 : vector<8x1xf32>
    %28 = arith.truncf %20 : vector<8x8xf32> to vector<8x8xbf16>
    %cst_17 = arith.constant dense<0.000000e+00> : vector<8x128xf32>
    %29 = tpu.matmul %28, %14, %cst_17 {dimension_numbers = #tpu.dot_dimension_numbers<[1], [0], [0], [1], [0, 0, 1, 1], [], []>} : vector<8x8xbf16>, vector<8x128xbf16>, vector<8x128xf32> -> vector<8x128xf32>
    %30 = vector.broadcast %27 : vector<8x1xf32> to vector<8x128xf32>
    %31 = arith.mulf %29, %30 : vector<8x128xf32>
    %c0_18 = arith.constant 0 : index
    %c0_19 = arith.constant 0 : index
    %32 = vector.load %arg7[%c0_18, %c0_19] : memref<8x256xf32, #tpu.memory_space<vmem>>, vector<8x128xf32>
    tpu.vector_store %arg7[%c0_18, %c0_19], %31 {strides = array<i32>} : memref<8x256xf32, #tpu.memory_space<vmem>>, vector<8x128xf32>,
    %33 = vector.extract_strided_slice %4 {offsets = [0, 128], sizes = [8, 128], strides = [1, 1]} : vector<8x256xf32> to vector<8x128xf32>
    %34 = arith.truncf %33 : vector<8x128xf32> to vector<8x128xbf16>
    %35 = vector.extract_strided_slice %6 {offsets = [0, 128], sizes = [8, 128], strides = [1, 1]} : vector<8x256xf32> to vector<8x128xf32>
    %36 = arith.truncf %35 : vector<8x128xf32> to vector<8x128xbf16>
    %37 = vector.extract_strided_slice %8 {offsets = [0, 128], sizes = [8, 128], strides = [1, 1]} : vector<8x256xf32> to vector<8x128xf32>
    %38 = arith.truncf %37 : vector<8x128xf32> to vector<8x128xbf16>
    %cst_20 = arith.constant dense<0.000000e+00> : vector<8x8xf32>
    %39 = tpu.matmul %34, %36, %cst_20 {dimension_numbers = #tpu.dot_dimension_numbers<[1], [1], [0], [0], [0, 0, 1, 0], [], []>} : vector<8x128xbf16>, vector<8x128xbf16>, vector<8x8xf32> -> vector<8x8xf32>
    %cst_21 = arith.constant dense<0xFF800000> : vector<8xf32>
    %40 = vector.multi_reduction <maximumf>, %39, %cst_21 [1] : vector<8x8xf32> to vector<8xf32>
    %41 = vector.shape_cast %40 : vector<8xf32> to vector<8x1xf32>
    %42 = vector.broadcast %41 : vector<8x1xf32> to vector<8x8xf32>
    %43 = arith.subf %39, %42 : vector<8x8xf32>
    %44 = math.exp %43 : vector<8x8xf32>
    %cst_22 = arith.constant dense<0.000000e+00> : vector<8xf32>
    %45 = vector.multi_reduction <add>, %44, %cst_22 [1] : vector<8x8xf32> to vector<8xf32>
    %46 = vector.shape_cast %45 : vector<8xf32> to vector<8x1xf32>
    %47 = tpu.reciprocal %46 {approx = true} : vector<8x1xf32> -> vector<8x1xf32>
    %48 = arith.mulf %46, %47 : vector<8x1xf32>
    %cst_23 = arith.constant 2.000000e+00 : f32
    %49 = vector.broadcast %cst_23 : f32 to vector<8x1xf32>
    %50 = arith.subf %49, %48 : vector<8x1xf32>
    %51 = arith.mulf %47, %50 : vector<8x1xf32>
    %52 = arith.truncf %44 : vector<8x8xf32> to vector<8x8xbf16>
    %cst_24 = arith.constant dense<0.000000e+00> : vector<8x128xf32>
    %53 = tpu.matmul %52, %38, %cst_24 {dimension_numbers = #tpu.dot_dimension_numbers<[1], [0], [0], [1], [0, 0, 1, 1], [], []>} : vector<8x8xbf16>, vector<8x128xbf16>, vector<8x128xf32> -> vector<8x128xf32>
    %54 = vector.broadcast %51 : vector<8x1xf32> to vector<8x128xf32>
    %55 = arith.mulf %53, %54 : vector<8x128xf32>
    %c0_25 = arith.constant 0 : index
    %c128 = arith.constant 128 : index
    %56 = vector.load %arg7[%c0_25, %c128] : memref<8x256xf32, #tpu.memory_space<vmem>>, vector<8x128xf32>
    tpu.vector_store %arg7[%c0_25, %c128], %55 {strides = array<i32>} : memref<8x256xf32, #tpu.memory_space<vmem>>, vector<8x128xf32>,
    return
  }
  func.func @transform_0(%arg0: i32) -> (i32, i32) {
    %c0_i32 = arith.constant 0 : i32
    %c0_i32_0 = arith.constant 0 : i32
    %c0_i32_1 = arith.constant 0 : i32
    return %c0_i32, %c0_i32_0 : i32, i32
  }
  func.func @transform_1(%arg0: i32) -> (i32, i32) {
    %c0_i32 = arith.constant 0 : i32
    %c0_i32_0 = arith.constant 0 : i32
    %c0_i32_1 = arith.constant 0 : i32
    return %c0_i32, %c0_i32_0 : i32, i32
  }
  func.func @transform_2(%arg0: i32) -> (i32, i32) {
    %c0_i32 = arith.constant 0 : i32
    %c0_i32_0 = arith.constant 0 : i32
    %c0_i32_1 = arith.constant 0 : i32
    return %c0_i32, %c0_i32_0 : i32, i32
  }
  func.func @transform_3(%arg0: i32) -> (i32, i32) {
    %c0_i32 = arith.constant 0 : i32
    %c0_i32_0 = arith.constant 0 : i32
    %c0_i32_1 = arith.constant 0 : i32
    return %c0_i32, %c0_i32_0 : i32, i32
  }
  func.func @transform_4(%arg0: i32) -> (i32, i32) {
    %c0_i32 = arith.constant 0 : i32
    %c0_i32_0 = arith.constant 0 : i32
    %c0_i32_1 = arith.constant 0 : i32
    return %c0_i32, %c0_i32_0 : i32, i32
  }
  func.func @transform_5(%arg0: i32) -> (i32, i32) {
    %c0_i32 = arith.constant 0 : i32
    %c0_i32_0 = arith.constant 0 : i32
    %c0_i32_1 = arith.constant 0 : i32
    return %c0_i32, %c0_i32_0 : i32, i32
  }
  func.func @transform_6(%arg0: i32) -> (i32, i32) {
    %c0_i32 = arith.constant 0 : i32
    %c0_i32_0 = arith.constant 0 : i32
    %c0_i32_1 = arith.constant 0 : i32
    return %c0_i32, %c0_i32_0 : i32, i32
  }
}

</mosaic_0001>

<bundles_post_ra>
// kernel: multi_head_attention.1
= control target key start
LH: loop header
LB: loop body
LE: loop exit
PB: predicated region body
PF: predicated region fallthrough
CT: control target
= control target key end

     0   :  { %11 = vsyncpa [#allocation3], 0  ;;  %s1111_s0 = inlined_call_operand.vmem [shape: bf16[8,128], index: 0, kind: input, shape index: {}]   ;;  %s1112_s1 = inlined_call_operand.vmem [shape: bf16[8,128], index: 1, kind: input, shape index: {}]   ;;  %s1113_s2 = inlined_call_operand.vmem [shape: bf16[8,128], index: 2, kind: input, shape index: {}]   ;;  %s1114_s3 = inlined_call_operand.hbm [shape: bf16[128,256], index: 3, kind: input, shape index: {}]   ;;  %s1115_s4 = inlined_call_operand.hbm [shape: bf16[128,256], index: 4, kind: input, shape index: {}]   ;;  %s1116_s5 = inlined_call_operand.hbm [shape: bf16[128,256], index: 5, kind: input, shape index: {}]   ;;  %s1117_s6 = inlined_call_operand.hbm [shape: f32[8,256], index: 6, kind: output, shape index: {}]  }
   0x1   :  { %12 = vsyncpa [#allocation6], 0 }
   0x2   :  { %13 = vsyncpa [#allocation4], 0  ;;  %s973_s21 = smov [#allocation5]   ;;  %s974_s23 = smov [#allocation2]  }
   0x3   :  { %s37_s22 = sshll.u32 %s973_s21, 4  ;;  %s25_s24 = sshll.u32 %s974_s23, 4  ;;  %s38_s22 = int_to_ptr.vmem [resolvable:$true] %s37_s22  ;;  %s1017_s24 = int_to_ptr.vmem [resolvable:$true] %s25_s24 }
   0x4   :  { %s879_s27 = scalar_lea.hbm %s1115_s4, 2048 }
   0x5   :  { %p880_p0 = scmp.ne.s32.totalorder %s1115_s4, %s879_s27  ;;  %p883_p1 = scmp.lt.u32.totalorder %s879_s27, %s1115_s4 }
   0x7   :  { %p885_p2 = pnand %p883_p1, %p880_p0 }
   0x9   :  { %888 = shalt.err (!%p885_p2)
}
   0xa   :  { %s889_s8 = scalar_lea.vmem %s38_s22, 2048  ;;  %p894_p4 = scmp.lt.s32.totalorder %s38_s22, %s38_s22 }
   0xb   :  { %p890_p3 = scmp.ne.s32.totalorder %s38_s22, %s889_s8  ;;  %p895_p5 = scmp.lt.s32.totalorder %s889_s8, %s889_s8 }
   0xd   :  { %p896_p6 = por %p895_p5, %p894_p4 }
   0xf   :  { %p897_p7 = pnand %p896_p6, %p890_p3 }
  0x11   :  { %900 = shalt.err (!%p897_p7)
}
  0x12   :  { %s975_s9 = smov 128   ;;  %s976_s10 = smov 8  }
  0x13   :  { %43 = dma.hbm_to_vmem [thread:$0]  %s1115_s4, 2048, %s38_s22, [#allocation6], %s975_s9, %s975_s9, %s976_s10  }
  0x14   :  { %s901_s15 = scalar_lea.hbm %s1114_s3, 2048 }
  0x15   :  { %p902_p8 = scmp.ne.s32.totalorder %s1114_s3, %s901_s15  ;;  %p905_p9 = scmp.lt.u32.totalorder %s901_s15, %s1114_s3 }
  0x17   :  { %p907_p10 = pnand %p905_p9, %p902_p8 }
  0x19   :  { %910 = shalt.err (!%p907_p10)
}
  0x1a   :  { %s911_s20 = scalar_lea.vmem %s1017_s24, 2048  ;;  %p916_p12 = scmp.lt.s32.totalorder %s1017_s24, %s1017_s24 }
  0x1b   :  { %p912_p11 = scmp.ne.s32.totalorder %s1017_s24, %s911_s20  ;;  %p917_p13 = scmp.lt.s32.totalorder %s911_s20, %s911_s20 }
  0x1d   :  { %p918_p0 = por %p917_p13, %p916_p12 }
  0x1f   :  { %p919_p1 = pnand %p918_p0, %p912_p11 }
  0x21   :  { %922 = shalt.err (!%p919_p1)
}
  0x22   :  { %31 = dma.hbm_to_vmem [thread:$0]  %s1114_s3, 2048, %s1017_s24, [#allocation3], %s975_s9, %s975_s9, %s976_s10  }
  0x23   :  { %s977_s22 = smov [#allocation7]   ;;  %s923_s27 = scalar_lea.hbm %s1116_s5, 2048 }
  0x24   :  { %s49_s23 = sshll.u32 %s977_s22, 4  ;;  %p924_p2 = scmp.ne.s32.totalorder %s1116_s5, %s923_s27  ;;  %s50_s23 = int_to_ptr.vmem [resolvable:$true] %s49_s23 }
  0x25   :  { %p927_p3 = scmp.lt.u32.totalorder %s923_s27, %s1116_s5 }
  0x27   :  { %p929_p4 = pnand %p927_p3, %p924_p2 }
  0x29   :  { %932 = shalt.err (!%p929_p4)
}
  0x2a   :  { %s933_s8 = scalar_lea.vmem %s50_s23, 2048  ;;  %p938_p6 = scmp.lt.s32.totalorder %s50_s23, %s50_s23 }
  0x2b   :  { %p934_p5 = scmp.ne.s32.totalorder %s50_s23, %s933_s8  ;;  %p939_p7 = scmp.lt.s32.totalorder %s933_s8, %s933_s8 }
  0x2d   :  { %p940_p8 = por %p939_p7, %p938_p6 }
  0x2f   :  { %p941_p9 = pnand %p940_p8, %p934_p5 }
  0x31   :  { %944 = shalt.err (!%p941_p9)
}
  0x32   :  { %55 = dma.hbm_to_vmem [thread:$0]  %s1116_s5, 2048, %s50_s23, [#allocation6], %s975_s9, %s975_s9, %s976_s10  }
  0x33   :  { %967 = dma.done.wait [#allocation3], 2048  }
  0x34   :  { %968 = vsyncadd [#allocation3], 4294965248 }
  0x35   :  { %969 = dma.done.wait [#allocation6], 4096  }
  0x36   :  { %970 = vsyncadd [#allocation6], 4294963200  ;;  %v978_v0 = vmov 0   ;;  %v799_v1 = vld [vmem:[#allocation5 + $0x4] ss:$8 sps:$4 sm:$0xff]   ;;  %v979_v35 = vmov 0.0  }
  0x37   :  { %334 = vmatprep.mubr.bf16.mxu1 %v978_v0  ;;  %197 = vmatprep.mubr.bf16.mxu0 %v978_v0  ;;  %v801_v2 = vld [vmem:[#allocation5] ss:$8 sps:$4 sm:$0xff]   ;;  %v802_v3 = vld [vmem:[#allocation5 + $0x14] ss:$8 sps:$4 sm:$0xff]   ;;  %v804_v4 = vld [vmem:[#allocation2 + $0x4] ss:$8 sps:$4 sm:$0xff]  }
  0x38   :  { %302 = vmatprep.subr.bf16.mxu1 %v799_v1  ;;  %v806_v5 = vld [vmem:[#allocation5 + $0x10] ss:$8 sps:$4 sm:$0xff]   ;;  %v807_v6 = vld [vmem:[#allocation2] ss:$8 sps:$4 sm:$0xff]   ;;  %v808_v7 = vld [vmem:[#allocation5 + $0x24] ss:$8 sps:$4 sm:$0xff]   ;;  %165 = vmatprep.subr.bf16.mxu0 %v804_v4 }
  0x39   :  { %303 = vmatpush1.bf16.msra.mxu1 %v801_v2  ;;  %v810_v8 = vld [vmem:[#allocation2 + $0x14] ss:$8 sps:$4 sm:$0xff]   ;;  %166 = vmatpush1.bf16.msra.mxu0 %v807_v6  ;;  %v813_v9 = vld [vmem:[#allocation2 + $0x10] ss:$8 sps:$4 sm:$0xff]   ;;  %v812_v10 = vld [vmem:[#allocation5 + $0x20] ss:$8 sps:$4 sm:$0xff]  }
  0x3a   :  { %304 = vmatprep.subr.bf16.mxu1 %v802_v3  ;;  %167 = vmatprep.subr.bf16.mxu0 %v810_v8  ;;  %v814_v11 = vld [vmem:[#allocation5 + $0x34] ss:$8 sps:$4 sm:$0xff]   ;;  %v816_v12 = vld [vmem:[#allocation2 + $0x24] ss:$8 sps:$4 sm:$0xff]   ;;  %v819_v13 = vld [vmem:[#allocation2 + $0x20] ss:$8 sps:$4 sm:$0xff]  }
  0x3b   :  { %v818_v14 = vld [vmem:[#allocation5 + $0x30] ss:$8 sps:$4 sm:$0xff]   ;;  %v822_v15 = vld [vmem:[#allocation2 + $0x34] ss:$8 sps:$4 sm:$0xff]   ;;  %v820_v16 = vld [vmem:[#allocation5 + $0x44] ss:$8 sps:$4 sm:$0xff]  }
  0x3c   :  { %v824_v17 = vld [vmem:[#allocation5 + $0x40] ss:$8 sps:$4 sm:$0xff]   ;;  %v825_v18 = vld [vmem:[#allocation2 + $0x30] ss:$8 sps:$4 sm:$0xff]   ;;  %v828_v19 = vld [vmem:[#allocation2 + $0x44] ss:$8 sps:$4 sm:$0xff]  }
  0x3d   :  { %305 = vmatpush1.bf16.msra.mxu1 %v806_v5  ;;  %168 = vmatpush1.bf16.msra.mxu0 %v813_v9  ;;  %v826_v20 = vld [vmem:[#allocation5 + $0x54] ss:$8 sps:$4 sm:$0xff]   ;;  %v831_v21 = vld [vmem:[#allocation2 + $0x40] ss:$8 sps:$4 sm:$0xff]   ;;  %v830_v22 = vld [vmem:[#allocation5 + $0x50] ss:$8 sps:$4 sm:$0xff]  }
  0x3e   :  { %306 = vmatprep.subr.bf16.mxu1 %v808_v7  ;;  %169 = vmatprep.subr.bf16.mxu0 %v816_v12  ;;  %v834_v23 = vld [vmem:[#allocation2 + $0x54] ss:$8 sps:$4 sm:$0xff]   ;;  %v832_v24 = vld [vmem:[#allocation5 + $0x64] ss:$8 sps:$4 sm:$0xff]   ;;  %v836_v25 = vld [vmem:[#allocation5 + $0x60] ss:$8 sps:$4 sm:$0xff]  }
  0x3f   :  { %v837_v26 = vld [vmem:[#allocation2 + $0x50] ss:$8 sps:$4 sm:$0xff]   ;;  %v840_v27 = vld [vmem:[#allocation2 + $0x64] ss:$8 sps:$4 sm:$0xff]   ;;  %v838_v28 = vld [vmem:[#allocation5 + $0x74] ss:$8 sps:$4 sm:$0xff]  }
  0x40   :  { %v843_v29 = vld [vmem:[#allocation2 + $0x60] ss:$8 sps:$4 sm:$0xff]   ;;  %v842_v30 = vld [vmem:[#allocation5 + $0x70] ss:$8 sps:$4 sm:$0xff]   ;;  %v844_v31 = vld [vmem:[#allocation2 + $0x74] ss:$8 sps:$4 sm:$0xff]  }
  0x41   :  { %307 = vmatpush1.bf16.msra.mxu1 %v812_v10  ;;  %170 = vmatpush1.bf16.msra.mxu0 %v819_v13  ;;  %v846_v32 = vld [vmem:[#allocation2 + $0x70] ss:$8 sps:$4 sm:$0xff]   ;;  %vm980_vm0 = vmmov 0   ;;  %v847_v36 = vld [vmem:[#allocation7] ss:$8 sps:$4 sm:$0xff]   ;;  %vm523_vm1 = vcmask 64512  }
  0x42   :  { %308 = vmatprep.subr.bf16.mxu1 %v814_v11  ;;  %171 = vmatprep.subr.bf16.mxu0 %v822_v15  ;;  %v67_v33 = vld [vmem:[%s1112_s1] sm:$0xf]  ;;  %v849_v37 = vld [vmem:[#allocation7 + $0x4] ss:$8 sps:$4 sm:$0xff]   ;;  %v852_v38 = vld [vmem:[#allocation7 + $0x14] ss:$8 sps:$4 sm:$0xff]  }
  0x43   :  { %v66_v34 = vld [vmem:[%s1111_s0] sm:$0xf]  ;;  %v855_v40 = vld [vmem:[#allocation7 + $0x24] ss:$8 sps:$4 sm:$0xff]   ;;  %v853_v41 = vld [vmem:[#allocation7 + $0x20] ss:$8 sps:$4 sm:$0xff]  }
  0x44   :  { %v850_v39 = vld [vmem:[#allocation7 + $0x10] ss:$8 sps:$4 sm:$0xff]   ;;  %v858_v42 = vld [vmem:[#allocation7 + $0x34] ss:$8 sps:$4 sm:$0xff]   ;;  %v861_v44 = vld [vmem:[#allocation7 + $0x44] ss:$8 sps:$4 sm:$0xff]  }
  0x45   :  { %309 = vmatpush1.bf16.msra.mxu1 %v818_v14  ;;  %172 = vmatpush1.bf16.msra.mxu0 %v825_v18  ;;  %v856_v43 = vld [vmem:[#allocation7 + $0x30] ss:$8 sps:$4 sm:$0xff]   ;;  %v859_v45 = vld [vmem:[#allocation7 + $0x40] ss:$8 sps:$4 sm:$0xff]   ;;  %v864_v46 = vld [vmem:[#allocation7 + $0x54] ss:$8 sps:$4 sm:$0xff]  }
  0x46   :  { %310 = vmatprep.subr.bf16.mxu1 %v820_v16  ;;  %173 = vmatprep.subr.bf16.mxu0 %v828_v19  ;;  %v862_v47 = vld [vmem:[#allocation7 + $0x50] ss:$8 sps:$4 sm:$0xff]   ;;  %v867_v48 = vld [vmem:[#allocation7 + $0x64] ss:$8 sps:$4 sm:$0xff]   ;;  %v865_v49 = vld [vmem:[#allocation7 + $0x60] ss:$8 sps:$4 sm:$0xff]  }
  0x47   :  { %v870_v50 = vld [vmem:[#allocation7 + $0x74] ss:$8 sps:$4 sm:$0xff]   ;;  %v868_v51 = vld [vmem:[#allocation7 + $0x70] ss:$8 sps:$4 sm:$0xff]   ;;  %vm541_vm2 = vcmask 1043456  }
  0x48   :  { %v68_v52 = vld [vmem:[%s1113_s2] sm:$0xf]  ;;  %s981_s2 = smov [#allocation8]  }
  0x49   :  { %311 = vmatpush1.bf16.msra.mxu1 %v824_v17  ;;  %174 = vmatpush1.bf16.msra.mxu0 %v831_v21  ;;  %s698_s12 = sshll.u32 %s981_s2, 4  ;;  %s699_s12 = int_to_ptr.vmem [resolvable:$true] %s698_s12 }
  0x4a   :  { %312 = vmatprep.subr.bf16.mxu1 %v826_v20  ;;  %175 = vmatprep.subr.bf16.mxu0 %v834_v23  ;;  %s945_s13 = scalar_lea.vmem %s699_s12, 256  ;;  %p950_p11 = scmp.lt.s32.totalorder %s699_s12, %s699_s12 }
  0x4b   :  { %p946_p10 = scmp.ne.s32.totalorder %s699_s12, %s945_s13  ;;  %p951_p12 = scmp.lt.s32.totalorder %s945_s13, %s945_s13 }
  0x4d   :  { %313 = vmatpush1.bf16.msra.mxu1 %v830_v22  ;;  %176 = vmatpush1.bf16.msra.mxu0 %v837_v26  ;;  %p952_p13 = por %p951_p12, %p950_p11 }
  0x4e   :  { %314 = vmatprep.subr.bf16.mxu1 %v832_v24  ;;  %177 = vmatprep.subr.bf16.mxu0 %v840_v27 }
  0x4f   :  { %p953_p0 = pnand %p952_p13, %p946_p10 }
  0x51   :  { %315 = vmatpush1.bf16.msra.mxu1 %v836_v25  ;;  %178 = vmatpush1.bf16.msra.mxu0 %v843_v29 }
  0x52   :  { %316 = vmatprep.subr.bf16.mxu1 %v838_v28  ;;  %179 = vmatprep.subr.bf16.mxu0 %v844_v31 }
  0x55   :  { %317 = vmatpush1.bf16.msra.mxu1 %v842_v30  ;;  %180 = vmatpush1.bf16.msra.mxu0 %v846_v32 }
  0x56   :  { %766 = vmatprep.subr.bf16.mxu1 %v979_v35  ;;  %439 = vmatprep.subr.bf16.mxu0 %v849_v37 }
  0x58   :  { %335 = vmatmul.mubr.bf16.vlgmr.msra.gmra.mrb[0].mxu1 %v67_v33  ;;  %198 = vmatmul.mubr.bf16.vlgmr.msra.gmra.mrb[0].mxu0 %v66_v34 }
  0x59   :  { %471 = vmatprep.mubr.bf16.mxu0 %v978_v0  ;;  %768 = vmatprep.mubr.msk.bf16.mxu1 %vm980_vm0, %v979_v35 }
  0x5a   :  { %440 = vmatpush1.bf16.msra.mxu0 %v847_v36 }
  0x5b   :  { %441 = vmatprep.subr.bf16.mxu0 %v852_v38 }
  0x5e   :  { %442 = vmatpush1.bf16.msra.mxu0 %v850_v39 }
  0x5f   :  { %443 = vmatprep.subr.bf16.mxu0 %v855_v40 }
  0x62   :  { %444 = vmatpush1.bf16.msra.mxu0 %v853_v41 }
  0x63   :  { %445 = vmatprep.subr.bf16.mxu0 %v858_v42 }
  0x66   :  { %446 = vmatpush1.bf16.msra.mxu0 %v856_v43 }
  0x67   :  { %447 = vmatprep.subr.bf16.mxu0 %v861_v44 }
  0x6a   :  { %448 = vmatpush1.bf16.msra.mxu0 %v859_v45 }
  0x6b   :  { %449 = vmatprep.subr.bf16.mxu0 %v864_v46 }
  0x6e   :  { %450 = vmatpush1.bf16.msra.mxu0 %v862_v47 }
  0x6f   :  { %451 = vmatprep.subr.bf16.mxu0 %v867_v48 }
  0x72   :  { %452 = vmatpush1.bf16.msra.mxu0 %v865_v49 }
  0x73   :  { %453 = vmatprep.subr.bf16.mxu0 %v870_v50 }
  0x76   :  { %454 = vmatpush1.bf16.msra.mxu0 %v868_v51 }
  0x79   :  { %472 = vmatmul.mubr.bf16.vlgmr.msra.gmra.mrb[4].mxu0 %v68_v52 }
 0x12b   :  { %v336_v53 = vpop.f32.mrb[0].mxu1  ;;  %v199_v58 = vpop.f32.mrb[0].mxu0 }
 0x12c   :  { %v481_v54 = vpack.c.bf16 %v336_v53, %v336_v53  ;;  %v338_v55 = vpop.f32.mrb[1].mxu1  ;;  %v201_v59 = vpop.f32.mrb[1].mxu0  ;;  %v480_v61 = vpack.c.bf16 %v199_v58, %v199_v58 }
 0x12d   :  { %v340_v56 = vpop.f32.mrb[2].mxu1  ;;  %v203_v60 = vpop.f32.mrb[2].mxu0  ;;  %v588_v18 = vpack.c.bf16 %v338_v55, %v338_v55  ;;  %v587_v19 = vpack.c.bf16 %v201_v59, %v201_v59 }
 0x12e   :  { %v341_v57 = vpop.f32.mrb[3].mxu1  ;;  %767 = vmatpush3.bf16.xpose.msra.mxu1 %v481_v54  ;;  %v204_v62 = vpop.f32.mrb[3].mxu0 }
 0x12f   :  { %772 = vmatprep.subr.bf16.mxu1 %v979_v35 }
 0x135   :  { %769 = vmatmul.mubr.bf16.vlgmr.msra.gmra.mrb[4].mxu1 %v480_v61 }
 0x136   :  { %774 = vmatprep.mubr.msk.bf16.mxu1 %vm980_vm0, %v979_v35 }
 0x14c   :  { %v473_v4 = vpop.f32.mrb[4].mxu0 }
 0x14d   :  { %v475_v5 = vpop.f32.mrb[5].mxu0  ;;  %v482_v6 = vpack.c.bf16 %v473_v4, %v473_v4 }
 0x14e   :  { %v589_v7 = vpack.c.bf16 %v475_v5, %v475_v5  ;;  %v477_v8 = vpop.f32.mrb[6].mxu0 }
 0x14f   :  { %v478_v9 = vpop.f32.mrb[7].mxu0  ;;  %v543_v10 = vsel %vm541_vm2, %v482_v6, 0 }
 0x150   :  { %v648_v11 = vsel %vm541_vm2, %v589_v7, 0  ;;  %773 = vmatpush3.bf16.msra.mxu1 %v543_v10 }
 0x151   :  { %778 = vmatprep.subr.bf16.mxu1 %v979_v35 }
 0x208   :  { %v517_v63 = vpop.f32.mrb[4].mxu1 }
 0x209   :  { %v770_v0 = vpop.f32.mrb[5].mxu1  ;;  %v524_v1 = vsel %vm523_vm1, %v517_v63, -inf }
 0x20a   :  { %525 = vmax.xlane.f32.xlu0 %v524_v1  ;;  %v520_v2 = vpop.f32.mrb[6].mxu1 }
 0x20b   :  { %v771_v3 = vpop.f32.mrb[7].mxu1 }
 0x297   :  { %v526_v12 = vpop.xlane.xlu0 %525 }
 0x298   :  { %v527_v13 = vsub.f32 %v517_v63, %v526_v12 }
 0x29a   :  { %v528_v14 = vmul.f32 1.442695, %v527_v13 }
 0x29c   :  { %871 = vpow2.f32 %v528_v14 }
 0x2a6   :  { %v872_v15 = vpop.eup %871 }
 0x2a7   :  { %v530_v16 = vsel %vm523_vm1, %v872_v15, 0.0  ;;  %v537_v17 = vpack.c.bf16 %v872_v15, %v872_v15 }
 0x2a8   :  { %531 = vadd.xlane.f32.xlu1 %v530_v16 }
 0x2a9   :  { %775 = vmatmul.mubr.msk.bf16.vlgmr.msra.gmra.mrb[8].mxu1 %vm523_vm1, %v537_v17 }
 0x2aa   :  { %779 = vmatpush3.bf16.xpose.msra.mxu1 %v588_v18  ;;  %780 = vmatprep.mubr.msk.bf16.mxu1 %vm980_vm0, %v979_v35 }
 0x2ab   :  { %784 = vmatprep.subr.bf16.mxu1 %v979_v35 }
 0x2b1   :  { %781 = vmatmul.mubr.bf16.vlgmr.msra.gmra.mrb[12].mxu1 %v587_v19 }
 0x2b2   :  { %785 = vmatpush3.bf16.msra.mxu1 %v648_v11  ;;  %786 = vmatprep.mubr.msk.bf16.mxu1 %vm980_vm0, %v979_v35 }
 0x335   :  { %v532_v20 = vpop.xlane.xlu1 %531 }
 0x336   :  { %873 = vrcp.f32 %v532_v20 }
 0x340   :  { %v874_v21 = vpop.eup %873 }
 0x341   :  { %v534_v22 = vmul.f32 %v874_v21, %v532_v20 }
 0x343   :  { %v535_v23 = vsub.f32 2.0, %v534_v22 }
 0x345   :  { %v536_v24 = vmul.f32 %v874_v21, %v535_v23 }
 0x37c   :  { %v579_v25 = vpop.f32.mrb[8].mxu1 }
 0x37d   :  { %v585_v26 = vmul.f32 %v579_v25, %v536_v24  ;;  %v776_v27 = vpop.f32.mrb[9].mxu1 }
 0x37e   :  { %v582_v28 = vpop.f32.mrb[10].mxu1 }
 0x37f   :  { %586 = vst [vmem:[#allocation8] sm:$0xff] %v585_v26  ;;  %v777_v29 = vpop.f32.mrb[11].mxu1 }
 0x384   :  { %v624_v30 = vpop.f32.mrb[12].mxu1 }
 0x385   :  { %v782_v31 = vpop.f32.mrb[13].mxu1  ;;  %v630_v32 = vsel %vm523_vm1, %v624_v30, -inf }
 0x386   :  { %631 = vmax.xlane.f32.xlu0 %v630_v32  ;;  %v627_v33 = vpop.f32.mrb[14].mxu1 }
 0x387   :  { %v783_v34 = vpop.f32.mrb[15].mxu1 }
 0x413   :  { %v632_v35 = vpop.xlane.xlu0 %631 }
 0x414   :  { %v633_v36 = vsub.f32 %v624_v30, %v632_v35 }
 0x416   :  { %v634_v37 = vmul.f32 1.442695, %v633_v36 }
 0x418   :  { %875 = vpow2.f32 %v634_v37 }
 0x422   :  { %v876_v38 = vpop.eup %875 }
 0x423   :  { %v636_v39 = vsel %vm523_vm1, %v876_v38, 0.0  ;;  %v643_v40 = vpack.c.bf16 %v876_v38, %v876_v38 }
 0x424   :  { %637 = vadd.xlane.f32.xlu1 %v636_v39 }
 0x425   :  { %787 = vmatmul.mubr.msk.bf16.vlgmr.msra.gmra.mrb[16].mxu1 %vm523_vm1, %v643_v40 }
 0x4b1   :  { %v638_v41 = vpop.xlane.xlu1 %637 }
 0x4b2   :  { %877 = vrcp.f32 %v638_v41 }
 0x4bc   :  { %v878_v42 = vpop.eup %877 }
 0x4bd   :  { %v640_v43 = vmul.f32 %v878_v42, %v638_v41 }
 0x4bf   :  { %v641_v44 = vsub.f32 2.0, %v640_v43 }
 0x4c1   :  { %v642_v45 = vmul.f32 %v878_v42, %v641_v44 }
 0x4f8   :  { %v684_v46 = vpop.f32.mrb[16].mxu1 }
 0x4f9   :  { %v690_v47 = vmul.f32 %v684_v46, %v642_v45  ;;  %v788_v48 = vpop.f32.mrb[17].mxu1 }
 0x4fa   :  { %v687_v49 = vpop.f32.mrb[18].mxu1 }
 0x4fb   :  { %691 = vst [vmem:[#allocation8 + $0x8] sm:$0xff] %v690_v47  ;;  %v789_v50 = vpop.f32.mrb[19].mxu1 }
 0x4fc   :  { %956 = shalt.err (!%p953_p0)
}
 0x4fd   :  { %s957_s16 = scalar_lea.hbm %s1117_s6, 256 }
 0x4fe   :  { %p958_p1 = scmp.ne.s32.totalorder %s1117_s6, %s957_s16  ;;  %p961_p2 = scmp.lt.u32.totalorder %s957_s16, %s1117_s6 }
 0x500   :  { %p963_p3 = pnand %p961_p2, %p958_p1 }
 0x502   :  { %966 = shalt.err (!%p963_p3)
}
 0x503   :  { %701 = dma.vmem_to_hbm [thread:$0]  %s699_s12, 256, %s1117_s6, [#allocation4]  }
 0x504   :  { %971 = dma.done.wait [#allocation4], 256  }
 0x505   :  { %972 = vsyncadd [#allocation4], 4294967040 }
 0x506   :  { %705 = vsyncpa [#allocation3], 1 }
 0x507   :  { %706 = vsyncpa [#allocation6], 1 }
 0x508   :  { %707 = vsyncpa [#allocation4], 1 }

</bundles_post_ra>
